<compile_context>
chip_gen: v6e
topology: v6e:2x2x1
jax: 0.10.0
libtpu: 0.0.40
codegen_flags: <defaults>
</compile_context>

<pallas_src>
import functools

import numpy as np
import jax
import jax.numpy as jnp
from jax.experimental import pallas as pl
from jax.experimental.pallas import tpu as pltpu


def _round_up(x, m):
    return ((x + m - 1) // m) * m


def critic_kernel(s_ref, a_ref, w1_ref, b1_ref, w2s_ref, w2a_ref, b2_ref,
                  w3_ref, b3_ref, out_ref):
    # fc1 + relu   (MXU)
    s1 = jnp.dot(s_ref[...], w1_ref[...], preferred_element_type=jnp.float32)
    s1 = jnp.maximum(s1 + b1_ref[...], 0.0)
    # fc2 on concat([s1, actions]) == s1 @ W2_s + actions @ W2_a   (MXU)
    h = jnp.dot(s1, w2s_ref[...], preferred_element_type=jnp.float32)
    h = h + jnp.dot(a_ref[...], w2a_ref[...], preferred_element_type=jnp.float32)
    h = jnp.maximum(h + b2_ref[...], 0.0)
    # fc3: output width 1 -> VPU multiply + lane reduction (skip the MXU).
    out = jnp.sum(h * w3_ref[...], axis=-1, keepdims=True)
    out_ref[...] = out + b3_ref[0]


def prepare_critic_params(params, state_dim, action_dim):
    """One-time weight prep: transpose, split W2 for the fused concat, and
    zero-pad hidden dims to lane multiples of 128.  Call once, off hot path."""
    w1, b1, w2, b2, w3, b3 = (params[k] for k in
                              ("w1", "b1", "w2", "b2", "w3", "b3"))
    h1 = w1.shape[0]
    h2 = w2.shape[0]
    h1p = _round_up(h1, 128)   # 400 -> 512
    h2p = _round_up(h2, 128)   # 300 -> 384

    w1_t = jnp.zeros((state_dim, h1p), jnp.float32).at[:, :h1].set(w1.T)
    b1_r = jnp.zeros((1, h1p), jnp.float32).at[0, :h1].set(b1)

    w2_s = jnp.zeros((h1p, h2p), jnp.float32).at[:h1, :h2].set(w2[:, :h1].T)
    w2_a = jnp.zeros((action_dim, h2p), jnp.float32).at[:, :h2].set(
        w2[:, h1:h1 + action_dim].T)
    b2_r = jnp.zeros((1, h2p), jnp.float32).at[0, :h2].set(b2)

    w3_row = jnp.zeros((1, h2p), jnp.float32).at[0, :h2].set(w3[0])
    b3_s = b3.reshape(1).astype(jnp.float32)

    return {
        "w1_t": w1_t, "b1": b1_r,
        "w2_s": w2_s, "w2_a": w2_a, "b2": b2_r,
        "w3": w3_row, "b3": b3_s,
    }


@functools.partial(jax.jit, static_argnames=("tile_m",))
def critic_forward(states, actions, prepped, tile_m=512):
    """states: [n, state_dim] f32, actions: [n, action_dim] f32 -> [n, 1] f32."""
    n, state_dim = states.shape
    action_dim = actions.shape[1]
    h1p = prepped["w1_t"].shape[1]
    h2p = prepped["w2_s"].shape[1]

    # Batch tile: multiple of 8 (sublane), capped at tile_m (multiple of 128).
    tile = min(tile_m, _round_up(n, 8))
    n_pad = _round_up(n, tile)
    if n_pad != n:
        states = jnp.pad(states, ((0, n_pad - n), (0, 0)))
        actions = jnp.pad(actions, ((0, n_pad - n), (0, 0)))

    def resident(shape):
        # Weights/biases: same block every grid step -> stay VMEM-resident.
        return pl.BlockSpec(shape, lambda i: (0, 0))

    in_specs = [
        pl.BlockSpec((tile, state_dim), lambda i: (i, 0)),    # states tile
        pl.BlockSpec((tile, action_dim), lambda i: (i, 0)),   # actions tile
        resident((state_dim, h1p)),                           # w1_t
        resident((1, h1p)),                                   # b1
        resident((h1p, h2p)),                                 # w2_s
        resident((action_dim, h2p)),                          # w2_a
        resident((1, h2p)),                                   # b2
        resident((1, h2p)),                                   # w3 row
        pl.BlockSpec(memory_space=pltpu.MemorySpace.SMEM),    # b3 scalar
    ]
    out_specs = pl.BlockSpec((tile, 1), lambda i: (i, 0))

    out = pl.pallas_call(
        critic_kernel,
        out_shape=jax.ShapeDtypeStruct((n_pad, 1), jnp.float32),
        grid=(n_pad // tile,),
        in_specs=in_specs,
        out_specs=out_specs,
        compiler_params=pltpu.CompilerParams(
            dimension_semantics=("parallel",)),
    )(states, actions, prepped["w1_t"], prepped["b1"], prepped["w2_s"],
      prepped["w2_a"], prepped["b2"], prepped["w3"], prepped["b3"])
    return out[:n]


def init_critic_params(key, state_dim, action_dim, h1=400, h2=300):
    """Deterministic init mirroring the PyTorch module's __init__ ranges."""
    ks = jax.random.split(key, 6)
    # fanin_init uses fanin = size[0]; for nn.Linear weight size = [out, in].
    v1 = 1.0 / np.sqrt(h1)
    v2 = 1.0 / np.sqrt(h2)
    params = {
        "w1": jax.random.uniform(ks[0], (h1, state_dim), jnp.float32, -v1, v1),
        "b1": jax.random.uniform(ks[1], (h1,), jnp.float32, -v1, v1),
        "w2": jax.random.uniform(ks[2], (h2, h1 + action_dim), jnp.float32, -v2, v2),
        "b2": jax.random.uniform(ks[3], (h2,), jnp.float32, -v2, v2),
        "w3": jax.random.uniform(ks[4], (1, h2), jnp.float32, -0.003, 0.003),
        "b3": jax.random.uniform(ks[5], (1,), jnp.float32, -0.003, 0.003),
    }
    return params


def critic_forward_ref(states, actions, params):
    """Pure-JAX reference for correctness check (unpadded, untransposed)."""
    s1 = jax.nn.relu(states @ params["w1"].T + params["b1"])
    x = jnp.concatenate([s1, actions], axis=1)
    x = jax.nn.relu(x @ params["w2"].T + params["b2"])
    return x @ params["w3"].T + params["b3"]


if __name__ == "__main__":
    key = jax.random.PRNGKey(0)
    k_params, k_s, k_a = jax.random.split(key, 3)

    n, state_dim, action_dim = 8, 16, 8
    params = init_critic_params(k_params, state_dim, action_dim, h1=400, h2=300)
    prepped = prepare_critic_params(params, state_dim, action_dim)  # once, off hot path

    states = jax.random.normal(k_s, (n, state_dim), jnp.float32)
    actions = jax.random.normal(k_a, (n, action_dim), jnp.float32)

    out = critic_forward(states, actions, prepped)
    out = jax.block_until_ready(out)

    ref = critic_forward_ref(states, actions, params)
    np.testing.assert_allclose(np.asarray(out), np.asarray(ref),
                               rtol=1e-5, atol=1e-5)
    assert out.shape == (n, 1)
    print("KERNEL_OK")
</pallas_src>

<mosaic_0001>
module attributes {stable_mosaic.version = 11 : i64} {
  func.func @critic_kernel(%arg0: i32, %arg1: memref<8x16xf32, #tpu.memory_space<vmem>>, %arg2: memref<8x8xf32, #tpu.memory_space<vmem>>, %arg3: memref<16x512xf32, #tpu.memory_space<vmem>>, %arg4: memref<1x512xf32, #tpu.memory_space<vmem>>, %arg5: memref<512x384xf32, #tpu.memory_space<vmem>>, %arg6: memref<8x384xf32, #tpu.memory_space<vmem>>, %arg7: memref<1x384xf32, #tpu.memory_space<vmem>>, %arg8: memref<1x384xf32, #tpu.memory_space<vmem>>, %arg9: memref<1xf32, #tpu.memory_space<smem>>, %arg10: memref<8x1xf32, #tpu.memory_space<vmem>>) attributes {dimension_semantics = [#tpu.dimension_semantics<parallel>], iteration_bounds = array<i64: 1>, scalar_prefetch = 0 : i64, scratch_operands = 0 : i64, tpu.core_type = #tpu.core_type<tc>, window_params = [{transform_indices = @transform_0, window_bounds = array<i64: 8, 16>}, {transform_indices = @transform_1, window_bounds = array<i64: 8, 8>}, {pipeline_mode = #tpu.pipeline_mode<synchronous>, transform_indices = @transform_2, window_bounds = array<i64: 16, 512>}, {pipeline_mode = #tpu.pipeline_mode<synchronous>, transform_indices = @transform_3, window_bounds = array<i64: 1, 512>}, {pipeline_mode = #tpu.pipeline_mode<synchronous>, transform_indices = @transform_4, window_bounds = array<i64: 512, 384>}, {pipeline_mode = #tpu.pipeline_mode<synchronous>, transform_indices = @transform_5, window_bounds = array<i64: 8, 384>}, {pipeline_mode = #tpu.pipeline_mode<synchronous>, transform_indices = @transform_6, window_bounds = array<i64: 1, 384>}, {pipeline_mode = #tpu.pipeline_mode<synchronous>, transform_indices = @transform_7, window_bounds = array<i64: 1, 384>}, {transform_indices = @transform_8, window_bounds = array<i64: 1>}, {transform_indices = @transform_9, window_bounds = array<i64: 8, 1>}]} {
    %c0 = arith.constant 0 : index
    %c0_0 = arith.constant 0 : index
    %0 = vector.load %arg1[%c0, %c0_0] : memref<8x16xf32, #tpu.memory_space<vmem>>, vector<8x16xf32>
    %c0_1 = arith.constant 0 : index
    %c0_2 = arith.constant 0 : index
    %1 = vector.load %arg3[%c0_1, %c0_2] : memref<16x512xf32, #tpu.memory_space<vmem>>, vector<16x512xf32>
    %cst = arith.constant dense<0.000000e+00> : vector<8x512xf32>
    %2 = tpu.matmul %0, %1, %cst {dimension_numbers = #tpu.dot_dimension_numbers<[1], [0], [0], [1], [0, 0, 1, 1], [], []>} : vector<8x16xf32>, vector<16x512xf32>, vector<8x512xf32> -> vector<8x512xf32>
    %c0_3 = arith.constant 0 : index
    %c0_4 = arith.constant 0 : index
    %3 = vector.load %arg4[%c0_3, %c0_4] : memref<1x512xf32, #tpu.memory_space<vmem>>, vector<1x512xf32>
    %4 = vector.broadcast %3 : vector<1x512xf32> to vector<8x512xf32>
    %5 = arith.addf %2, %4 : vector<8x512xf32>
    %cst_5 = arith.constant 0.000000e+00 : f32
    %6 = vector.broadcast %cst_5 : f32 to vector<8x512xf32>
    %7 = arith.maximumf %5, %6 : vector<8x512xf32>
    %c0_6 = arith.constant 0 : index
    %c0_7 = arith.constant 0 : index
    %8 = vector.load %arg5[%c0_6, %c0_7] : memref<512x384xf32, #tpu.memory_space<vmem>>, vector<512x384xf32>
    %cst_8 = arith.constant dense<0.000000e+00> : vector<8x384xf32>
    %9 = tpu.matmul %7, %8, %cst_8 {dimension_numbers = #tpu.dot_dimension_numbers<[1], [0], [0], [1], [0, 0, 1, 1], [], []>} : vector<8x512xf32>, vector<512x384xf32>, vector<8x384xf32> -> vector<8x384xf32>
    %c0_9 = arith.constant 0 : index
    %c0_10 = arith.constant 0 : index
    %10 = vector.load %arg2[%c0_9, %c0_10] : memref<8x8xf32, #tpu.memory_space<vmem>>, vector<8x8xf32>
    %c0_11 = arith.constant 0 : index
    %c0_12 = arith.constant 0 : index
    %11 = vector.load %arg6[%c0_11, %c0_12] : memref<8x384xf32, #tpu.memory_space<vmem>>, vector<8x384xf32>
    %cst_13 = arith.constant dense<0.000000e+00> : vector<8x384xf32>
    %12 = tpu.matmul %10, %11, %cst_13 {dimension_numbers = #tpu.dot_dimension_numbers<[1], [0], [0], [1], [0, 0, 1, 1], [], []>} : vector<8x8xf32>, vector<8x384xf32>, vector<8x384xf32> -> vector<8x384xf32>
    %13 = arith.addf %9, %12 : vector<8x384xf32>
    %c0_14 = arith.constant 0 : index
    %c0_15 = arith.constant 0 : index
    %14 = vector.load %arg7[%c0_14, %c0_15] : memref<1x384xf32, #tpu.memory_space<vmem>>, vector<1x384xf32>
    %15 = vector.broadcast %14 : vector<1x384xf32> to vector<8x384xf32>
    %16 = arith.addf %13, %15 : vector<8x384xf32>
    %cst_16 = arith.constant 0.000000e+00 : f32
    %17 = vector.broadcast %cst_16 : f32 to vector<8x384xf32>
    %18 = arith.maximumf %16, %17 : vector<8x384xf32>
    %c0_17 = arith.constant 0 : index
    %c0_18 = arith.constant 0 : index
    %19 = vector.load %arg8[%c0_17, %c0_18] : memref<1x384xf32, #tpu.memory_space<vmem>>, vector<1x384xf32>
    %20 = vector.broadcast %19 : vector<1x384xf32> to vector<8x384xf32>
    %21 = arith.mulf %18, %20 : vector<8x384xf32>
    %cst_19 = arith.constant dense<0.000000e+00> : vector<8xf32>
    %22 = vector.multi_reduction <add>, %21, %cst_19 [1] : vector<8x384xf32> to vector<8xf32>
    %23 = vector.shape_cast %22 : vector<8xf32> to vector<8x1xf32>
    %c0_20 = arith.constant 0 : index
    %24 = memref.load %arg9[%c0_20] : memref<1xf32, #tpu.memory_space<smem>>
    %25 = vector.broadcast %24 : f32 to vector<8x1xf32>
    %26 = arith.addf %23, %25 : vector<8x1xf32>
    %c0_21 = arith.constant 0 : index
    %c0_22 = arith.constant 0 : index
    %27 = vector.load %arg10[%c0_21, %c0_22] : memref<8x1xf32, #tpu.memory_space<vmem>>, vector<8x1xf32>
    tpu.vector_store %arg10[%c0_21, %c0_22], %26 {strides = array<i32>} : memref<8x1xf32, #tpu.memory_space<vmem>>, vector<8x1xf32>,
    return
  }
  func.func @transform_0(%arg0: i32) -> (i32, i32) {
    %c0_i32 = arith.constant 0 : i32
    %c0_i32_0 = arith.constant 0 : i32
    return %arg0, %c0_i32 : i32, i32
  }
  func.func @transform_1(%arg0: i32) -> (i32, i32) {
    %c0_i32 = arith.constant 0 : i32
    %c0_i32_0 = arith.constant 0 : i32
    return %arg0, %c0_i32 : i32, i32
  }
  func.func @transform_2(%arg0: i32) -> (i32, i32) {
    %c0_i32 = arith.constant 0 : i32
    %c0_i32_0 = arith.constant 0 : i32
    %c0_i32_1 = arith.constant 0 : i32
    return %c0_i32, %c0_i32_0 : i32, i32
  }
  func.func @transform_3(%arg0: i32) -> (i32, i32) {
    %c0_i32 = arith.constant 0 : i32
    %c0_i32_0 = arith.constant 0 : i32
    %c0_i32_1 = arith.constant 0 : i32
    return %c0_i32, %c0_i32_0 : i32, i32
  }
  func.func @transform_4(%arg0: i32) -> (i32, i32) {
    %c0_i32 = arith.constant 0 : i32
    %c0_i32_0 = arith.constant 0 : i32
    %c0_i32_1 = arith.constant 0 : i32
    return %c0_i32, %c0_i32_0 : i32, i32
  }
  func.func @transform_5(%arg0: i32) -> (i32, i32) {
    %c0_i32 = arith.constant 0 : i32
    %c0_i32_0 = arith.constant 0 : i32
    %c0_i32_1 = arith.constant 0 : i32
    return %c0_i32, %c0_i32_0 : i32, i32
  }
  func.func @transform_6(%arg0: i32) -> (i32, i32) {
    %c0_i32 = arith.constant 0 : i32
    %c0_i32_0 = arith.constant 0 : i32
    %c0_i32_1 = arith.constant 0 : i32
    return %c0_i32, %c0_i32_0 : i32, i32
  }
  func.func @transform_7(%arg0: i32) -> (i32, i32) {
    %c0_i32 = arith.constant 0 : i32
    %c0_i32_0 = arith.constant 0 : i32
    %c0_i32_1 = arith.constant 0 : i32
    return %c0_i32, %c0_i32_0 : i32, i32
  }
  func.func @transform_8(%arg0: i32) -> i32 {
    %c0_i32 = arith.constant 0 : i32
    %c0_i32_0 = arith.constant 0 : i32
    return %c0_i32 : i32
  }
  func.func @transform_9(%arg0: i32) -> (i32, i32) {
    %c0_i32 = arith.constant 0 : i32
    %c0_i32_0 = arith.constant 0 : i32
    return %arg0, %c0_i32 : i32, i32
  }
}

</mosaic_0001>

<bundles_post_ra>
// kernel: critic_forward.1
= control target key start
LH: loop header
LB: loop body
LE: loop exit
PB: predicated region body
PF: predicated region fallthrough
CT: control target
= control target key end

     0   :  { %15 = vsyncpa [#allocation4], 0  ;;  %s1279_s0 = inlined_call_operand.hbm [shape: f32[8,16], index: 0, kind: input, shape index: {}]   ;;  %s1280_s1 = inlined_call_operand.hbm [shape: f32[8,8], index: 1, kind: input, shape index: {}]   ;;  %s1281_s2 = inlined_call_operand.hbm [shape: f32[16,512], index: 2, kind: input, shape index: {}]   ;;  %s1282_s3 = inlined_call_operand.vmem [shape: f32[1,512], index: 3, kind: input, shape index: {}]   ;;  %s1283_s4 = inlined_call_operand.hbm [shape: f32[512,384], index: 4, kind: input, shape index: {}]   ;;  %s1284_s5 = inlined_call_operand.hbm [shape: f32[8,384], index: 5, kind: input, shape index: {}]   ;;  %s1285_s6 = inlined_call_operand.vmem [shape: f32[1,384], index: 6, kind: input, shape index: {}]   ;;  %s1286_s7 = inlined_call_operand.vmem [shape: f32[1,384], index: 7, kind: input, shape index: {}]   ;;  %s1287_s8 = inlined_call_operand.<no memory space> [shape: f32[1], index: 8, kind: input, shape index: {}]   ;;  %s1288_s9 = inlined_call_operand.vmem [shape: f32[8,1], index: 9, kind: output, shape index: {}]  }
   0x1   :  { %16 = vsyncpa [#allocation6], 0 }
   0x2   :  { %17 = vsyncpa [#allocation9], 0  ;;  %s1156_s30 = smov [#allocation5]   ;;  %s1157_s11 = smov [#allocation8]  }
   0x3   :  { %s34_s10 = sshll.u32 %s1156_s30, 4  ;;  %s57_s12 = sshll.u32 %s1157_s11, 4  ;;  %s35_s10 = int_to_ptr.vmem [resolvable:$true] %s34_s10  ;;  %s58_s12 = int_to_ptr.vmem [resolvable:$true] %s57_s12 }
   0x4   :  { %s1058_s13 = scalar_lea.vmem %s35_s10, 128  ;;  %p1063_p1 = scmp.lt.s32.totalorder %s35_s10, %s35_s10 }
   0x5   :  { %p1059_p0 = scmp.ne.s32.totalorder %s35_s10, %s1058_s13  ;;  %p1064_p2 = scmp.lt.s32.totalorder %s1058_s13, %s1058_s13 }
   0x7   :  { %p1065_p3 = por %p1064_p2, %p1063_p1 }
   0x9   :  { %p1066_p4 = pnand %p1065_p3, %p1059_p0 }
   0xb   :  { %1069 = shalt.err (!%p1066_p4)
}
   0xc   :  { %37 = dma.hbm_to_vmem [thread:$0]  %s1280_s1, 128, %s35_s10, [#allocation6]  }
   0xd   :  { %s1078_s16 = scalar_lea.vmem %s58_s12, 24576  ;;  %p1083_p6 = scmp.lt.s32.totalorder %s58_s12, %s58_s12 }
   0xe   :  { %p1079_p5 = scmp.ne.s32.totalorder %s58_s12, %s1078_s16  ;;  %p1084_p7 = scmp.lt.s32.totalorder %s1078_s16, %s1078_s16 }
  0x10   :  { %p1085_p8 = por %p1084_p7, %p1083_p6 }
  0x12   :  { %p1086_p9 = pnand %p1085_p8, %p1079_p5 }
  0x14   :  { %1089 = shalt.err (!%p1086_p9)
}
  0x15   :  { %s1158_s17 = smov 384   ;;  %s1159_s18 = smov 24  }
  0x16   :  { %63 = dma.hbm_to_vmem [thread:$0]  %s1283_s4, 24576, %s58_s12, [#allocation9], %s1158_s17, %s1158_s17, %s1159_s18  }
  0x17   :  { %s1160_s21 = smov [#allocation3]   ;;  %s1161_s23 = smov [#allocation7]  }
  0x18   :  { %s24_s22 = sshll.u32 %s1160_s21, 4  ;;  %s43_s24 = sshll.u32 %s1161_s23, 4  ;;  %s25_s22 = int_to_ptr.vmem [resolvable:$true] %s24_s22  ;;  %s44_s24 = int_to_ptr.vmem [resolvable:$true] %s43_s24 }
  0x19   :  { %s1098_s1 = scalar_lea.vmem %s25_s22, 128  ;;  %p1103_p11 = scmp.lt.s32.totalorder %s25_s22, %s25_s22 }
  0x1a   :  { %p1099_p10 = scmp.ne.s32.totalorder %s25_s22, %s1098_s1  ;;  %p1104_p12 = scmp.lt.s32.totalorder %s1098_s1, %s1098_s1 }
  0x1c   :  { %p1105_p13 = por %p1104_p12, %p1103_p11 }
  0x1e   :  { %p1106_p0 = pnand %p1105_p13, %p1099_p10 }
  0x20   :  { %1109 = shalt.err (!%p1106_p0)
}
  0x21   :  { %27 = dma.hbm_to_vmem [thread:$0]  %s1279_s0, 128, %s25_s22, [#allocation4]  }
  0x22   :  { %s1118_s27 = scalar_lea.vmem %s44_s24, 1024  ;;  %p1123_p2 = scmp.lt.s32.totalorder %s44_s24, %s44_s24 }
  0x23   :  { %p1119_p1 = scmp.ne.s32.totalorder %s44_s24, %s1118_s27  ;;  %p1124_p3 = scmp.lt.s32.totalorder %s1118_s27, %s1118_s27 }
  0x25   :  { %p1125_p4 = por %p1124_p3, %p1123_p2 }
  0x27   :  { %p1126_p5 = pnand %p1125_p4, %p1119_p1 }
  0x29   :  { %1129 = shalt.err (!%p1126_p5)
}
  0x2a   :  { %s1162_s4 = smov 512   ;;  %s1163_s28 = smov 32  }
  0x2b   :  { %49 = dma.hbm_to_vmem [thread:$0]  %s1281_s2, 1024, %s44_s24, [#allocation6], %s1162_s4, %s1162_s4, %s1163_s28  }
  0x2c   :  { %s1164_s10 = smov [#allocation10]  }
  0x2d   :  { %s70_s11 = sshll.u32 %s1164_s10, 4  ;;  %s71_s11 = int_to_ptr.vmem [resolvable:$true] %s70_s11 }
  0x2e   :  { %s1138_s12 = scalar_lea.vmem %s71_s11, 384  ;;  %p1143_p7 = scmp.lt.s32.totalorder %s71_s11, %s71_s11 }
  0x2f   :  { %p1139_p6 = scmp.ne.s32.totalorder %s71_s11, %s1138_s12  ;;  %p1144_p8 = scmp.lt.s32.totalorder %s1138_s12, %s1138_s12 }
  0x31   :  { %p1145_p9 = por %p1144_p8, %p1143_p7 }
  0x33   :  { %p1146_p10 = pnand %p1145_p9, %p1139_p6 }
  0x35   :  { %1149 = shalt.err (!%p1146_p10)
}
  0x36   :  { %73 = dma.hbm_to_vmem [thread:$0]  %s1284_s5, 384, %s71_s11, [#allocation9]  }
  0x37   :  { %1150 = dma.done.wait [#allocation4], 128  }
  0x38   :  { %1151 = vsyncadd [#allocation4], 4294967168 }
  0x39   :  { %1152 = dma.done.wait [#allocation6], 1152  }
  0x3a   :  { %1153 = vsyncadd [#allocation6], 4294966144 }
  0x3b   :  { %1154 = dma.done.wait [#allocation9], 24960  }
  0x3c   :  { %1155 = vsyncadd [#allocation9], 4294942336  ;;  %v1165_v0 = vmov 0.0   ;;  %v101_v1 = vld [vmem:[#allocation7 + $0x28] sm:$0xff]  ;;  %v103_v2 = vld [vmem:[#allocation7 + $0x38] sm:$0xff]  ;;  %vm126_vm0 = vcmask 130048  }
  0x3d   :  { %194 = vmatprep.mubr.f32.mxu0 %v1165_v0  ;;  %265 = vmatprep.mubr.f32.mxu1 %v1165_v0  ;;  %v100_v3 = vld [vmem:[#allocation7 + $0x20] sm:$0xff]  ;;  %v102_v4 = vld [vmem:[#allocation7 + $0x30] sm:$0xff]  ;;  %v97_v5 = vld [vmem:[#allocation7 + $0x8] sm:$0xff]  ;;  %vm472_vm1 = vcmask 64512   ;;  %vm1166_vm2 = vmmov 0   ;;  %vm949_vm3 = vcmask 7168  }
  0x3e   :  { %158 = vmatprep.subr.mxu0 %v101_v1  ;;  %229 = vmatprep.subr.mxu1 %v103_v2  ;;  %v99_v6 = vld [vmem:[#allocation7 + $0x18] sm:$0xff]  ;;  %v96_v7 = vld [vmem:[#allocation7] sm:$0xff]  ;;  %v98_v8 = vld [vmem:[#allocation7 + $0x10] sm:$0xff] }
  0x3f   :  { %159 = vmatpush1.msra.mxu0 %v100_v3  ;;  %230 = vmatpush1.msra.mxu1 %v102_v4  ;;  %v95_v9 = vld [vmem:[#allocation3] sm:$0xff]  ;;  %v470_v10 = vld [vmem:[#allocation10 + $0x8] sm:$0xff]  ;;  %v469_v11 = vld [vmem:[#allocation10] sm:$0xff] }
  0x40   :  { %160 = vmatprep.subr.mxu0 %v97_v5  ;;  %231 = vmatprep.subr.mxu1 %v99_v6  ;;  %v471_v12 = vld [vmem:[#allocation10 + $0x10] sm:$0xff]  ;;  %v468_v13 = vld [vmem:[#allocation5] sm:$0xff]  ;;  %v321_v16 = vld [vmem:[#allocation8 + $0x168] sm:$0xff] }
  0x41   :  { %161 = vmatpush1.msra.mxu0 %v96_v7  ;;  %232 = vmatpush1.msra.mxu1 %v98_v8  ;;  %v322_v14 = vld [vmem:[#allocation8 + $0x170] sm:$0xff]  ;;  %v417_v17 = vld [vmem:[#allocation8 + $0x468] sm:$0xff]  ;;  %v319_v18 = vld [vmem:[#allocation8 + $0x158] sm:$0xff] }
  0x42   :  { %958 = vmatmul.mubr.msk.f32.vlgmr.msra.gmra.mxu0 %vm126_vm0, %v95_v9  ;;  %959 = vmatmul.mubr.msk.f32.vlgmr.msra.gmra.mxu1 %vm126_vm0, %v95_v9  ;;  %v418_v15 = vld [vmem:[#allocation8 + $0x470] sm:$0xff]  ;;  %v415_v19 = vld [vmem:[#allocation8 + $0x458] sm:$0xff]  ;;  %v316_v22 = vld [vmem:[#allocation8 + $0x140] sm:$0xff] }
  0x43   :  { %506 = vmatprep.subr.mxu0 %v470_v10  ;;  %540 = vmatprep.mubr.f32.mxu0 %v1165_v0  ;;  %v318_v20 = vld [vmem:[#allocation8 + $0x150] sm:$0xff]  ;;  %v412_v23 = vld [vmem:[#allocation8 + $0x440] sm:$0xff]  ;;  %v315_v24 = vld [vmem:[#allocation8 + $0x138] sm:$0xff] }
  0x44   :  { %507 = vmatpush1.msra.mxu0 %v469_v11  ;;  %1034 = vmatprep.subr.mxu1 %v1165_v0  ;;  %v414_v21 = vld [vmem:[#allocation8 + $0x450] sm:$0xff]  ;;  %v411_v25 = vld [vmem:[#allocation8 + $0x438] sm:$0xff]  ;;  %v313_v26 = vld [vmem:[#allocation8 + $0x128] sm:$0xff] }
  0x45   :  { %1035 = vmatpush3.msra.mxu1 %v471_v12  ;;  %1036 = vmatprep.mubr.msk.f32.mxu1 %vm1166_vm2, %v1165_v0  ;;  %v409_v27 = vld [vmem:[#allocation8 + $0x428] sm:$0xff]  ;;  %v312_v28 = vld [vmem:[#allocation8 + $0x120] sm:$0xff]  ;;  %v310_v30 = vld [vmem:[#allocation8 + $0x110] sm:$0xff] }
  0x46   :  { %960 = vmatmul.mubr.msk.f32.vlgmr.msra.gmra.mxu0 %vm472_vm1, %v468_v13  ;;  %617 = vmatprep.subr.mxu0 %v322_v14  ;;  %v408_v29 = vld [vmem:[#allocation8 + $0x420] sm:$0xff]  ;;  %v406_v31 = vld [vmem:[#allocation8 + $0x410] sm:$0xff]  ;;  %v309_v32 = vld [vmem:[#allocation8 + $0x108] sm:$0xff] }
  0x47   :  { %688 = vmatprep.subr.mxu1 %v418_v15  ;;  %1037 = vmatmul.mubr.msk.f32.vlgmr.msra.gmra.mxu1 %vm472_vm1, %v468_v13  ;;  %v405_v33 = vld [vmem:[#allocation8 + $0x408] sm:$0xff]  ;;  %v307_v34 = vld [vmem:[#allocation8 + $0xf8] sm:$0xff]  ;;  %v306_v36 = vld [vmem:[#allocation8 + $0xf0] sm:$0xff] }
  0x48   :  { %618 = vmatpush1.msra.mxu0 %v321_v16  ;;  %689 = vmatpush1.msra.mxu1 %v417_v17  ;;  %v403_v35 = vld [vmem:[#allocation8 + $0x3f8] sm:$0xff]  ;;  %v402_v37 = vld [vmem:[#allocation8 + $0x3f0] sm:$0xff]  ;;  %v304_v38 = vld [vmem:[#allocation8 + $0xe0] sm:$0xff] }
  0x49   :  { %619 = vmatprep.subr.mxu0 %v319_v18  ;;  %690 = vmatprep.subr.mxu1 %v415_v19  ;;  %v400_v39 = vld [vmem:[#allocation8 + $0x3e0] sm:$0xff]  ;;  %v303_v40 = vld [vmem:[#allocation8 + $0xd8] sm:$0xff]  ;;  %v301_v42 = vld [vmem:[#allocation8 + $0xc8] sm:$0xff] }
  0x4a   :  { %620 = vmatpush1.msra.mxu0 %v318_v20  ;;  %691 = vmatpush1.msra.mxu1 %v414_v21  ;;  %v399_v41 = vld [vmem:[#allocation8 + $0x3d8] sm:$0xff]  ;;  %v397_v43 = vld [vmem:[#allocation8 + $0x3c8] sm:$0xff]  ;;  %v300_v44 = vld [vmem:[#allocation8 + $0xc0] sm:$0xff] }
  0x4b   :  { %621 = vmatprep.subr.mxu0 %v316_v22  ;;  %692 = vmatprep.subr.mxu1 %v412_v23  ;;  %v396_v45 = vld [vmem:[#allocation8 + $0x3c0] sm:$0xff]  ;;  %v298_v46 = vld [vmem:[#allocation8 + $0xb0] sm:$0xff]  ;;  %v297_v48 = vld [vmem:[#allocation8 + $0xa8] sm:$0xff] }
  0x4c   :  { %622 = vmatpush1.msra.mxu0 %v315_v24  ;;  %693 = vmatpush1.msra.mxu1 %v411_v25  ;;  %v394_v47 = vld [vmem:[#allocation8 + $0x3b0] sm:$0xff]  ;;  %v393_v49 = vld [vmem:[#allocation8 + $0x3a8] sm:$0xff]  ;;  %v295_v50 = vld [vmem:[#allocation8 + $0x98] sm:$0xff] }
  0x4d   :  { %623 = vmatprep.subr.mxu0 %v313_v26  ;;  %694 = vmatprep.subr.mxu1 %v409_v27  ;;  %v391_v51 = vld [vmem:[#allocation8 + $0x398] sm:$0xff]  ;;  %v294_v52 = vld [vmem:[#allocation8 + $0x90] sm:$0xff]  ;;  %v292_v54 = vld [vmem:[#allocation8 + $0x80] sm:$0xff] }
  0x4e   :  { %624 = vmatpush1.msra.mxu0 %v312_v28  ;;  %695 = vmatpush1.msra.mxu1 %v408_v29  ;;  %v390_v53 = vld [vmem:[#allocation8 + $0x390] sm:$0xff]  ;;  %v388_v55 = vld [vmem:[#allocation8 + $0x380] sm:$0xff]  ;;  %v291_v56 = vld [vmem:[#allocation8 + $0x78] sm:$0xff] }
  0x4f   :  { %625 = vmatprep.subr.mxu0 %v310_v30  ;;  %696 = vmatprep.subr.mxu1 %v406_v31  ;;  %v387_v57 = vld [vmem:[#allocation8 + $0x378] sm:$0xff]  ;;  %v289_v58 = vld [vmem:[#allocation8 + $0x68] sm:$0xff]  ;;  %v288_v60 = vld [vmem:[#allocation8 + $0x60] sm:$0xff] }
  0x50   :  { %626 = vmatpush1.msra.mxu0 %v309_v32  ;;  %697 = vmatpush1.msra.mxu1 %v405_v33  ;;  %v385_v59 = vld [vmem:[#allocation8 + $0x368] sm:$0xff]  ;;  %v384_v61 = vld [vmem:[#allocation8 + $0x360] sm:$0xff]  ;;  %v286_v62 = vld [vmem:[#allocation8 + $0x50] sm:$0xff] }
  0x51   :  { %627 = vmatprep.subr.mxu0 %v307_v34  ;;  %698 = vmatprep.subr.mxu1 %v403_v35  ;;  %v382_v63 = vld [vmem:[#allocation8 + $0x350] sm:$0xff]  ;;  %v285_v0 = vld [vmem:[#allocation8 + $0x48] sm:$0xff]  ;;  %v283_v2 = vld [vmem:[#allocation8 + $0x38] sm:$0xff] }
  0x52   :  { %628 = vmatpush1.msra.mxu0 %v306_v36  ;;  %699 = vmatpush1.msra.mxu1 %v402_v37  ;;  %v381_v1 = vld [vmem:[#allocation8 + $0x348] sm:$0xff]  ;;  %v379_v3 = vld [vmem:[#allocation8 + $0x338] sm:$0xff]  ;;  %v282_v4 = vld [vmem:[#allocation8 + $0x30] sm:$0xff] }
  0x53   :  { %629 = vmatprep.subr.mxu0 %v304_v38  ;;  %700 = vmatprep.subr.mxu1 %v400_v39  ;;  %v378_v5 = vld [vmem:[#allocation8 + $0x330] sm:$0xff]  ;;  %v280_v6 = vld [vmem:[#allocation8 + $0x20] sm:$0xff]  ;;  %v279_v8 = vld [vmem:[#allocation8 + $0x18] sm:$0xff] }
  0x54   :  { %630 = vmatpush1.msra.mxu0 %v303_v40  ;;  %701 = vmatpush1.msra.mxu1 %v399_v41  ;;  %v376_v7 = vld [vmem:[#allocation8 + $0x320] sm:$0xff]  ;;  %v375_v9 = vld [vmem:[#allocation8 + $0x318] sm:$0xff]  ;;  %v277_v10 = vld [vmem:[#allocation8 + $0x8] sm:$0xff] }
  0x55   :  { %631 = vmatprep.subr.mxu0 %v301_v42  ;;  %702 = vmatprep.subr.mxu1 %v397_v43  ;;  %v373_v11 = vld [vmem:[#allocation8 + $0x308] sm:$0xff]  ;;  %v276_v12 = vld [vmem:[#allocation8] sm:$0xff]  ;;  %v370_v14 = vld [vmem:[#allocation8 + $0x2f0] sm:$0xff] }
  0x56   :  { %632 = vmatpush1.msra.mxu0 %v300_v44  ;;  %703 = vmatpush1.msra.mxu1 %v396_v45  ;;  %v372_v13 = vld [vmem:[#allocation8 + $0x300] sm:$0xff]  ;;  %v466_v15 = vld [vmem:[#allocation8 + $0x5f0] sm:$0xff]  ;;  %v369_v16 = vld [vmem:[#allocation8 + $0x2e8] sm:$0xff] }
  0x57   :  { %633 = vmatprep.subr.mxu0 %v298_v46  ;;  %704 = vmatprep.subr.mxu1 %v394_v47  ;;  %v465_v17 = vld [vmem:[#allocation8 + $0x5e8] sm:$0xff]  ;;  %v367_v18 = vld [vmem:[#allocation8 + $0x2d8] sm:$0xff]  ;;  %v366_v20 = vld [vmem:[#allocation8 + $0x2d0] sm:$0xff] }
  0x58   :  { %634 = vmatpush1.msra.mxu0 %v297_v48  ;;  %705 = vmatpush1.msra.mxu1 %v393_v49  ;;  %v463_v19 = vld [vmem:[#allocation8 + $0x5d8] sm:$0xff]  ;;  %v462_v21 = vld [vmem:[#allocation8 + $0x5d0] sm:$0xff]  ;;  %v364_v22 = vld [vmem:[#allocation8 + $0x2c0] sm:$0xff] }
  0x59   :  { %635 = vmatprep.subr.mxu0 %v295_v50  ;;  %706 = vmatprep.subr.mxu1 %v391_v51  ;;  %v460_v23 = vld [vmem:[#allocation8 + $0x5c0] sm:$0xff]  ;;  %v363_v24 = vld [vmem:[#allocation8 + $0x2b8] sm:$0xff]  ;;  %v361_v26 = vld [vmem:[#allocation8 + $0x2a8] sm:$0xff] }
  0x5a   :  { %636 = vmatpush1.msra.mxu0 %v294_v52  ;;  %707 = vmatpush1.msra.mxu1 %v390_v53  ;;  %v459_v25 = vld [vmem:[#allocation8 + $0x5b8] sm:$0xff]  ;;  %v457_v27 = vld [vmem:[#allocation8 + $0x5a8] sm:$0xff]  ;;  %v360_v28 = vld [vmem:[#allocation8 + $0x2a0] sm:$0xff] }
  0x5b   :  { %637 = vmatprep.subr.mxu0 %v292_v54  ;;  %708 = vmatprep.subr.mxu1 %v388_v55  ;;  %v456_v29 = vld [vmem:[#allocation8 + $0x5a0] sm:$0xff]  ;;  %v358_v30 = vld [vmem:[#allocation8 + $0x290] sm:$0xff]  ;;  %v357_v32 = vld [vmem:[#allocation8 + $0x288] sm:$0xff] }
  0x5c   :  { %638 = vmatpush1.msra.mxu0 %v291_v56  ;;  %709 = vmatpush1.msra.mxu1 %v387_v57  ;;  %v454_v31 = vld [vmem:[#allocation8 + $0x590] sm:$0xff]  ;;  %v453_v33 = vld [vmem:[#allocation8 + $0x588] sm:$0xff]  ;;  %v355_v34 = vld [vmem:[#allocation8 + $0x278] sm:$0xff] }
  0x5d   :  { %639 = vmatprep.subr.mxu0 %v289_v58  ;;  %710 = vmatprep.subr.mxu1 %v385_v59  ;;  %v451_v35 = vld [vmem:[#allocation8 + $0x578] sm:$0xff]  ;;  %v354_v36 = vld [vmem:[#allocation8 + $0x270] sm:$0xff]  ;;  %v352_v38 = vld [vmem:[#allocation8 + $0x260] sm:$0xff] }
  0x5e   :  { %640 = vmatpush1.msra.mxu0 %v288_v60  ;;  %711 = vmatpush1.msra.mxu1 %v384_v61  ;;  %v450_v37 = vld [vmem:[#allocation8 + $0x570] sm:$0xff]  ;;  %v448_v39 = vld [vmem:[#allocation8 + $0x560] sm:$0xff]  ;;  %v351_v40 = vld [vmem:[#allocation8 + $0x258] sm:$0xff] }
  0x5f   :  { %641 = vmatprep.subr.mxu0 %v286_v62  ;;  %712 = vmatprep.subr.mxu1 %v382_v63  ;;  %v447_v41 = vld [vmem:[#allocation8 + $0x558] sm:$0xff]  ;;  %v349_v42 = vld [vmem:[#allocation8 + $0x248] sm:$0xff]  ;;  %v348_v44 = vld [vmem:[#allocation8 + $0x240] sm:$0xff] }
  0x60   :  { %642 = vmatpush1.msra.mxu0 %v285_v0  ;;  %713 = vmatpush1.msra.mxu1 %v381_v1  ;;  %v445_v43 = vld [vmem:[#allocation8 + $0x548] sm:$0xff]  ;;  %v444_v45 = vld [vmem:[#allocation8 + $0x540] sm:$0xff]  ;;  %v346_v46 = vld [vmem:[#allocation8 + $0x230] sm:$0xff] }
  0x61   :  { %643 = vmatprep.subr.mxu0 %v283_v2  ;;  %714 = vmatprep.subr.mxu1 %v379_v3  ;;  %v442_v47 = vld [vmem:[#allocation8 + $0x530] sm:$0xff]  ;;  %v345_v48 = vld [vmem:[#allocation8 + $0x228] sm:$0xff]  ;;  %v343_v50 = vld [vmem:[#allocation8 + $0x218] sm:$0xff] }
  0x62   :  { %644 = vmatpush1.msra.mxu0 %v282_v4  ;;  %715 = vmatpush1.msra.mxu1 %v378_v5  ;;  %v441_v49 = vld [vmem:[#allocation8 + $0x528] sm:$0xff]  ;;  %v439_v51 = vld [vmem:[#allocation8 + $0x518] sm:$0xff]  ;;  %v342_v52 = vld [vmem:[#allocation8 + $0x210] sm:$0xff] }
  0x63   :  { %645 = vmatprep.subr.mxu0 %v280_v6  ;;  %716 = vmatprep.subr.mxu1 %v376_v7  ;;  %v438_v53 = vld [vmem:[#allocation8 + $0x510] sm:$0xff]  ;;  %v340_v54 = vld [vmem:[#allocation8 + $0x200] sm:$0xff]  ;;  %v339_v56 = vld [vmem:[#allocation8 + $0x1f8] sm:$0xff] }
  0x64   :  { %646 = vmatpush1.msra.mxu0 %v279_v8  ;;  %717 = vmatpush1.msra.mxu1 %v375_v9  ;;  %v436_v55 = vld [vmem:[#allocation8 + $0x500] sm:$0xff]  ;;  %v435_v57 = vld [vmem:[#allocation8 + $0x4f8] sm:$0xff]  ;;  %v337_v58 = vld [vmem:[#allocation8 + $0x1e8] sm:$0xff] }
  0x65   :  { %647 = vmatprep.subr.mxu0 %v277_v10  ;;  %718 = vmatprep.subr.mxu1 %v373_v11  ;;  %v433_v59 = vld [vmem:[#allocation8 + $0x4e8] sm:$0xff]  ;;  %v336_v60 = vld [vmem:[#allocation8 + $0x1e0] sm:$0xff]  ;;  %v334_v62 = vld [vmem:[#allocation8 + $0x1d0] sm:$0xff] }
  0x66   :  { %648 = vmatpush1.msra.mxu0 %v276_v12  ;;  %719 = vmatpush1.msra.mxu1 %v372_v13  ;;  %v432_v61 = vld [vmem:[#allocation8 + $0x4e0] sm:$0xff]  ;;  %v430_v63 = vld [vmem:[#allocation8 + $0x4d0] sm:$0xff]  ;;  %v333_v0 = vld [vmem:[#allocation8 + $0x1c8] sm:$0xff] }
  0x67   :  { %649 = vmatprep.subr.mxu0 %v370_v14  ;;  %720 = vmatprep.subr.mxu1 %v466_v15  ;;  %v429_v1 = vld [vmem:[#allocation8 + $0x4c8] sm:$0xff]  ;;  %v331_v2 = vld [vmem:[#allocation8 + $0x1b8] sm:$0xff]  ;;  %v330_v4 = vld [vmem:[#allocation8 + $0x1b0] sm:$0xff] }
  0x68   :  { %650 = vmatpush2.msra.mxu0 %v369_v16  ;;  %721 = vmatpush2.msra.mxu1 %v465_v17  ;;  %v427_v3 = vld [vmem:[#allocation8 + $0x4b8] sm:$0xff]  ;;  %v426_v5 = vld [vmem:[#allocation8 + $0x4b0] sm:$0xff]  ;;  %v328_v6 = vld [vmem:[#allocation8 + $0x1a0] sm:$0xff]  ;;  %v106_v16 = vlaneseq }
  0x69   :  { %651 = vmatprep.subr.mxu0 %v367_v18  ;;  %722 = vmatprep.subr.mxu1 %v463_v19  ;;  %v424_v7 = vld [vmem:[#allocation8 + $0x4a0] sm:$0xff]  ;;  %v327_v8 = vld [vmem:[#allocation8 + $0x198] sm:$0xff]  ;;  %v325_v10 = vld [vmem:[#allocation8 + $0x188] sm:$0xff] }
  0x6a   :  { %652 = vmatpush2.msra.mxu0 %v366_v20  ;;  %723 = vmatpush2.msra.mxu1 %v462_v21  ;;  %v423_v9 = vld [vmem:[#allocation8 + $0x498] sm:$0xff]  ;;  %v421_v11 = vld [vmem:[#allocation8 + $0x488] sm:$0xff]  ;;  %v324_v12 = vld [vmem:[#allocation8 + $0x180] sm:$0xff]  ;;  %v107_v17 = vshrl.u32 %v106_v16, 7 }
  0x6b   :  { %653 = vmatprep.subr.mxu0 %v364_v22  ;;  %724 = vmatprep.subr.mxu1 %v460_v23  ;;  %v420_v13 = vld [vmem:[#allocation8 + $0x480] sm:$0xff]  ;;  %v371_v14 = vld [vmem:[#allocation8 + $0x2f8] sm:$0xff]  ;;  %v104_v20 = vld [vmem:[%s1282_s3] sm:$0xf] }
  0x6c   :  { %654 = vmatpush2.msra.mxu0 %v363_v24  ;;  %725 = vmatpush2.msra.mxu1 %v459_v25  ;;  %v467_v15 = vld [vmem:[#allocation8 + $0x5f8] sm:$0xff]  ;;  %v1232_v18 = vsub.s32 2, %v107_v17  ;;  %v1234_v19 = vsub.s32 0, %v107_v17  ;;  %v1239_v21 = vsub.s32 1, %v107_v17  ;;  %v120_v22 = vsub.s32 3, %v107_v17  ;;  %v437_v16 = vld [vmem:[#allocation8 + $0x508] sm:$0xff] }
  0x6d   :  { %655 = vmatprep.subr.mxu0 %v361_v26  ;;  %726 = vmatprep.subr.mxu1 %v457_v27  ;;  %v293_v17 = vld [vmem:[#allocation8 + $0x88] sm:$0xff] }
  0x6e   :  { %656 = vmatpush2.msra.mxu0 %v360_v28  ;;  %727 = vmatpush2.msra.mxu1 %v456_v29  ;;  %v117_v23 = vrot.slane %v104_v20, %v1232_v18  ;;  %v109_v24 = vrot.slane %v104_v20, %v1234_v19  ;;  %v113_v25 = vrot.slane %v104_v20, %v1239_v21 }
  0x6f   :  { %657 = vmatprep.subr.mxu0 %v358_v30  ;;  %728 = vmatprep.subr.mxu1 %v454_v31  ;;  %v121_v26 = vrot.slane %v104_v20, %v120_v22  ;;  %v389_v20 = vld [vmem:[#allocation8 + $0x388] sm:$0xff]  ;;  %v338_v22 = vld [vmem:[#allocation8 + $0x1f0] sm:$0xff] }
  0x70   :  { %658 = vmatpush2.msra.mxu0 %v357_v32  ;;  %729 = vmatpush2.msra.mxu1 %v453_v33 }
  0x71   :  { %659 = vmatprep.subr.mxu0 %v355_v34  ;;  %730 = vmatprep.subr.mxu1 %v451_v35 }
  0x72   :  { %660 = vmatpush2.msra.mxu0 %v354_v36  ;;  %731 = vmatpush2.msra.mxu1 %v450_v37 }
  0x73   :  { %661 = vmatprep.subr.mxu0 %v352_v38  ;;  %732 = vmatprep.subr.mxu1 %v448_v39 }
  0x74   :  { %662 = vmatpush2.msra.mxu0 %v351_v40  ;;  %733 = vmatpush2.msra.mxu1 %v447_v41  ;;  %v323_v40 = vld [vmem:[#allocation8 + $0x178] sm:$0xff] }
  0x75   :  { %663 = vmatprep.subr.mxu0 %v349_v42  ;;  %734 = vmatprep.subr.mxu1 %v445_v43  ;;  %v419_v41 = vld [vmem:[#allocation8 + $0x478] sm:$0xff]  ;;  %v368_v42 = vld [vmem:[#allocation8 + $0x2e0] sm:$0xff] }
  0x76   :  { %664 = vmatpush2.msra.mxu0 %v348_v44  ;;  %735 = vmatpush2.msra.mxu1 %v444_v45  ;;  %v464_v44 = vld [vmem:[#allocation8 + $0x5e0] sm:$0xff] }
  0x77   :  { %665 = vmatprep.subr.mxu0 %v346_v46  ;;  %736 = vmatprep.subr.mxu1 %v442_v47  ;;  %v320_v45 = vld [vmem:[#allocation8 + $0x160] sm:$0xff]  ;;  %v365_v47 = vld [vmem:[#allocation8 + $0x2c8] sm:$0xff] }
  0x78   :  { %666 = vmatpush2.msra.mxu0 %v345_v48  ;;  %737 = vmatpush2.msra.mxu1 %v441_v49  ;;  %v416_v46 = vld [vmem:[#allocation8 + $0x460] sm:$0xff]  ;;  %v461_v48 = vld [vmem:[#allocation8 + $0x5c8] sm:$0xff] }
  0x79   :  { %667 = vmatprep.subr.mxu0 %v343_v50  ;;  %738 = vmatprep.subr.mxu1 %v439_v51  ;;  %v317_v49 = vld [vmem:[#allocation8 + $0x148] sm:$0xff]  ;;  %v362_v51 = vld [vmem:[#allocation8 + $0x2b0] sm:$0xff] }
  0x7a   :  { %668 = vmatpush2.msra.mxu0 %v342_v52  ;;  %739 = vmatpush2.msra.mxu1 %v438_v53  ;;  %v413_v50 = vld [vmem:[#allocation8 + $0x448] sm:$0xff]  ;;  %v458_v52 = vld [vmem:[#allocation8 + $0x5b0] sm:$0xff] }
  0x7b   :  { %669 = vmatprep.subr.mxu0 %v340_v54  ;;  %740 = vmatprep.subr.mxu1 %v436_v55  ;;  %v314_v53 = vld [vmem:[#allocation8 + $0x130] sm:$0xff]  ;;  %v359_v55 = vld [vmem:[#allocation8 + $0x298] sm:$0xff] }
  0x7c   :  { %670 = vmatpush2.msra.mxu0 %v339_v56  ;;  %741 = vmatpush2.msra.mxu1 %v435_v57  ;;  %v410_v54 = vld [vmem:[#allocation8 + $0x430] sm:$0xff]  ;;  %v455_v56 = vld [vmem:[#allocation8 + $0x598] sm:$0xff] }
  0x7d   :  { %671 = vmatprep.subr.mxu0 %v337_v58  ;;  %742 = vmatprep.subr.mxu1 %v433_v59  ;;  %v311_v57 = vld [vmem:[#allocation8 + $0x118] sm:$0xff]  ;;  %v356_v59 = vld [vmem:[#allocation8 + $0x280] sm:$0xff] }
  0x7e   :  { %672 = vmatpush2.msra.mxu0 %v336_v60  ;;  %743 = vmatpush2.msra.mxu1 %v432_v61  ;;  %v407_v58 = vld [vmem:[#allocation8 + $0x418] sm:$0xff]  ;;  %v452_v60 = vld [vmem:[#allocation8 + $0x580] sm:$0xff] }
  0x7f   :  { %673 = vmatprep.subr.mxu0 %v334_v62  ;;  %744 = vmatprep.subr.mxu1 %v430_v63  ;;  %v308_v61 = vld [vmem:[#allocation8 + $0x100] sm:$0xff]  ;;  %v353_v63 = vld [vmem:[#allocation8 + $0x268] sm:$0xff] }
  0x80   :  { %674 = vmatpush2.msra.mxu0 %v333_v0  ;;  %745 = vmatpush2.msra.mxu1 %v429_v1  ;;  %v404_v62 = vld [vmem:[#allocation8 + $0x400] sm:$0xff]  ;;  %v449_v0 = vld [vmem:[#allocation8 + $0x568] sm:$0xff] }
  0x81   :  { %675 = vmatprep.subr.mxu0 %v331_v2  ;;  %746 = vmatprep.subr.mxu1 %v427_v3  ;;  %v305_v1 = vld [vmem:[#allocation8 + $0xe8] sm:$0xff]  ;;  %v350_v3 = vld [vmem:[#allocation8 + $0x250] sm:$0xff] }
  0x82   :  { %676 = vmatpush2.msra.mxu0 %v330_v4  ;;  %747 = vmatpush2.msra.mxu1 %v426_v5  ;;  %v401_v2 = vld [vmem:[#allocation8 + $0x3e8] sm:$0xff]  ;;  %v446_v4 = vld [vmem:[#allocation8 + $0x550] sm:$0xff] }
  0x83   :  { %677 = vmatprep.subr.mxu0 %v328_v6  ;;  %748 = vmatprep.subr.mxu1 %v424_v7  ;;  %v302_v5 = vld [vmem:[#allocation8 + $0xd0] sm:$0xff]  ;;  %v347_v7 = vld [vmem:[#allocation8 + $0x238] sm:$0xff] }
  0x84   :  { %678 = vmatpush2.msra.mxu0 %v327_v8  ;;  %749 = vmatpush2.msra.mxu1 %v423_v9  ;;  %v398_v6 = vld [vmem:[#allocation8 + $0x3d0] sm:$0xff]  ;;  %v443_v8 = vld [vmem:[#allocation8 + $0x538] sm:$0xff] }
  0x85   :  { %679 = vmatprep.subr.mxu0 %v325_v10  ;;  %750 = vmatprep.subr.mxu1 %v421_v11  ;;  %v299_v9 = vld [vmem:[#allocation8 + $0xb8] sm:$0xff]  ;;  %v344_v11 = vld [vmem:[#allocation8 + $0x220] sm:$0xff] }
  0x86   :  { %680 = vmatpush2.msra.mxu0 %v324_v12  ;;  %751 = vmatpush2.msra.mxu1 %v420_v13  ;;  %v395_v10 = vld [vmem:[#allocation8 + $0x3b8] sm:$0xff]  ;;  %v440_v12 = vld [vmem:[#allocation8 + $0x520] sm:$0xff] }
  0x87   :  { %964 = vmatprep.subr.mxu0 %v371_v14  ;;  %999 = vmatprep.subr.mxu1 %v467_v15  ;;  %v296_v13 = vld [vmem:[#allocation8 + $0xa0] sm:$0xff]  ;;  %v341_v15 = vld [vmem:[#allocation8 + $0x208] sm:$0xff] }
  0x88   :  { %v392_v14 = vld [vmem:[#allocation8 + $0x3a0] sm:$0xff] }
 0x102   :  { %v196_v27 = vpop.f32.mrf.mxu0  ;;  %v267_v28 = vpop.f32.mrf.mxu1 }
 0x103   :  { %v1244_v29 = vadd.f32 %v267_v28, %v117_v23  ;;  %v1246_v30 = vadd.f32 %v196_v27, %v109_v24  ;;  %v434_v23 = vld [vmem:[#allocation8 + $0x4f0] sm:$0xff]  ;;  %v431_v27 = vld [vmem:[#allocation8 + $0x4d8] sm:$0xff] }
 0x104   :  { %v198_v31 = vpop.f32.mrf.mxu0  ;;  %v269_v32 = vpop.f32.mrf.mxu1  ;;  %v290_v24 = vld [vmem:[#allocation8 + $0x70] sm:$0xff]  ;;  %v287_v28 = vld [vmem:[#allocation8 + $0x58] sm:$0xff] }
 0x105   :  { %v199_v33 = vadd.f32 %v198_v31, %v113_v25  ;;  %v270_v34 = vadd.f32 %v269_v32, %v121_v26  ;;  %v274_v35 = vmax.f32 %v1244_v29, 0.0  ;;  %v272_v39 = vmax.f32 %v1246_v30, 0.0  ;;  %v386_v25 = vld [vmem:[#allocation8 + $0x370] sm:$0xff]  ;;  %v335_v26 = vld [vmem:[#allocation8 + $0x1d8] sm:$0xff]  ;;  %v332_v32 = vld [vmem:[#allocation8 + $0x1c0] sm:$0xff] }
 0x106   :  { %v383_v31 = vld [vmem:[#allocation8 + $0x358] sm:$0xff] }
 0x107   :  { %v273_v36 = vmax.f32 %v199_v33, 0.0  ;;  %v275_v37 = vmax.f32 %v270_v34, 0.0  ;;  %v1249_v38 = vpop.f32.mrf.mxu1  ;;  %v428_v33 = vld [vmem:[#allocation8 + $0x4c0] sm:$0xff] }
 0x108   :  { %v284_v34 = vld [vmem:[#allocation8 + $0x40] sm:$0xff] }
 0x109   :  { %681 = vmatprep.mubr.f32.mxu0 %v273_v36  ;;  %752 = vmatprep.mubr.f32.mxu1 %v275_v37  ;;  %v1038_v43 = vpop.f32.mrf.mxu1 }
 0x10a   :  { %682 = vmatmul.mubr.f32.vlgmr.msra.gmra.mxu0 %v272_v39  ;;  %753 = vmatmul.mubr.f32.vlgmr.msra.gmra.mxu1 %v274_v35  ;;  %v326_v43 = vld [vmem:[#allocation8 + $0x190] sm:$0xff] }
 0x10b   :  { %965 = vmatpush3.msra.mxu0 %v323_v40  ;;  %1000 = vmatpush3.msra.mxu1 %v419_v41  ;;  %v425_v40 = vld [vmem:[#allocation8 + $0x4a8] sm:$0xff] }
 0x10c   :  { %966 = vmatprep.subr.mxu0 %v368_v42  ;;  %823 = vmatprep.mubr.f32.mxu0 %v273_v36  ;;  %v380_v36 = vld [vmem:[#allocation8 + $0x340] sm:$0xff]  ;;  %v281_v41 = vld [vmem:[#allocation8 + $0x28] sm:$0xff] }
 0x10d   :  { %1001 = vmatprep.subr.mxu1 %v464_v44  ;;  %893 = vmatprep.mubr.f32.mxu1 %v275_v37  ;;  %v329_v37 = vld [vmem:[#allocation8 + $0x1a8] sm:$0xff]  ;;  %v422_v44 = vld [vmem:[#allocation8 + $0x490] sm:$0xff] }
 0x10e   :  { %967 = vmatpush3.msra.mxu0 %v320_v45  ;;  %1002 = vmatpush3.msra.mxu1 %v416_v46  ;;  %v377_v42 = vld [vmem:[#allocation8 + $0x328] sm:$0xff]  ;;  %v278_v45 = vld [vmem:[#allocation8 + $0x10] sm:$0xff] }
 0x10f   :  { %968 = vmatprep.subr.mxu0 %v365_v47  ;;  %1003 = vmatprep.subr.mxu1 %v461_v48  ;;  %v374_v46 = vld [vmem:[#allocation8 + $0x310] sm:$0xff]  ;;  %v542_v47 = vpop.f32.mrf.mxu0 }
 0x110   :  { %969 = vmatpush3.msra.mxu0 %v317_v49  ;;  %1004 = vmatpush3.msra.mxu1 %v413_v50 }
 0x111   :  { %970 = vmatprep.subr.mxu0 %v362_v51  ;;  %1005 = vmatprep.subr.mxu1 %v458_v52  ;;  %v544_v48 = vpop.f32.mrf.mxu0 }
 0x112   :  { %971 = vmatpush3.msra.mxu0 %v314_v53  ;;  %1006 = vmatpush3.msra.mxu1 %v410_v54  ;;  %v899_v54 = vld [vmem:[%s1285_s6] sm:$0x7] }
 0x113   :  { %972 = vmatprep.subr.mxu0 %v359_v55  ;;  %1007 = vmatprep.subr.mxu1 %v455_v56 }
 0x114   :  { %973 = vmatpush3.msra.mxu0 %v311_v57  ;;  %1008 = vmatpush3.msra.mxu1 %v407_v58  ;;  %v908_v57 = vrot.slane %v899_v54, %v1239_v21 }
 0x115   :  { %974 = vmatprep.subr.mxu0 %v356_v59  ;;  %1009 = vmatprep.subr.mxu1 %v452_v60 }
 0x116   :  { %975 = vmatpush3.msra.mxu0 %v308_v61  ;;  %1010 = vmatpush3.msra.mxu1 %v404_v62 }
 0x117   :  { %976 = vmatprep.subr.mxu0 %v353_v63  ;;  %1011 = vmatprep.subr.mxu1 %v449_v0  ;;  %v922_v63 = vld [vmem:[%s1286_s7] sm:$0x7] }
 0x118   :  { %977 = vmatpush3.msra.mxu0 %v305_v1  ;;  %1012 = vmatpush3.msra.mxu1 %v401_v2  ;;  %v931_v0 = vrot.slane %v922_v63, %v1239_v21  ;;  %v947_v21 = vstv %s1287_s8 }
 0x119   :  { %978 = vmatprep.subr.mxu0 %v350_v3  ;;  %1013 = vmatprep.subr.mxu1 %v446_v4  ;;  %v912_v4 = vrot.slane %v899_v54, %v1232_v18 }
 0x11a   :  { %979 = vmatpush3.msra.mxu0 %v302_v5  ;;  %1014 = vmatpush3.msra.mxu1 %v398_v6 }
 0x11b   :  { %980 = vmatprep.subr.mxu0 %v347_v7  ;;  %1015 = vmatprep.subr.mxu1 %v443_v8  ;;  %v927_v7 = vrot.slane %v922_v63, %v1234_v19 }
 0x11c   :  { %981 = vmatpush3.msra.mxu0 %v299_v9  ;;  %1016 = vmatpush3.msra.mxu1 %v395_v10  ;;  %v935_v9 = vrot.slane %v922_v63, %v1232_v18 }
 0x11d   :  { %982 = vmatprep.subr.mxu0 %v344_v11  ;;  %1017 = vmatprep.subr.mxu1 %v440_v12 }
 0x11e   :  { %983 = vmatpush3.msra.mxu0 %v296_v13  ;;  %1018 = vmatpush3.msra.mxu1 %v392_v14 }
 0x11f   :  { %984 = vmatprep.subr.mxu0 %v341_v15  ;;  %1019 = vmatprep.subr.mxu1 %v437_v16 }
 0x120   :  { %985 = vmatpush3.msra.mxu0 %v293_v17  ;;  %1020 = vmatpush3.msra.mxu1 %v389_v20 }
 0x121   :  { %986 = vmatprep.subr.mxu0 %v338_v22  ;;  %1021 = vmatprep.subr.mxu1 %v434_v23 }
 0x122   :  { %987 = vmatpush3.msra.mxu0 %v290_v24  ;;  %1022 = vmatpush3.msra.mxu1 %v386_v25 }
 0x123   :  { %988 = vmatprep.subr.mxu0 %v335_v26  ;;  %1023 = vmatprep.subr.mxu1 %v431_v27 }
 0x124   :  { %989 = vmatpush3.msra.mxu0 %v287_v28  ;;  %1024 = vmatpush3.msra.mxu1 %v383_v31 }
 0x125   :  { %990 = vmatprep.subr.mxu0 %v332_v32  ;;  %1025 = vmatprep.subr.mxu1 %v428_v33 }
 0x126   :  { %991 = vmatpush3.msra.mxu0 %v284_v34  ;;  %1026 = vmatpush3.msra.mxu1 %v380_v36 }
 0x127   :  { %992 = vmatprep.subr.mxu0 %v329_v37  ;;  %1027 = vmatprep.subr.mxu1 %v425_v40 }
 0x128   :  { %993 = vmatpush3.msra.mxu0 %v281_v41  ;;  %1028 = vmatpush3.msra.mxu1 %v377_v42 }
 0x129   :  { %994 = vmatprep.subr.mxu0 %v326_v43  ;;  %1029 = vmatprep.subr.mxu1 %v422_v44 }
 0x12a   :  { %995 = vmatpush3.msra.mxu0 %v278_v45  ;;  %1030 = vmatpush3.msra.mxu1 %v374_v46 }
 0x12b   :  { %824 = vmatmul.mubr.f32.vlgmr.msra.gmra.mxu0 %v272_v39  ;;  %894 = vmatmul.mubr.f32.vlgmr.msra.gmra.mxu1 %v274_v35  ;;  %v904_v39 = vrot.slane %v899_v54, %v1234_v19 }
 0x1ca   :  { %v683_v49 = vpop.f32.mrf.mxu0  ;;  %v754_v51 = vpop.f32.mrf.mxu1 }
 0x1cb   :  { %v684_v53 = vadd.f32 %v683_v49, %v542_v47 }
 0x1cc   :  { %v685_v50 = vpop.f32.mrf.mxu0  ;;  %v756_v55 = vpop.f32.mrf.mxu1 }
 0x1cd   :  { %v686_v52 = vadd.f32 %v685_v50, %v544_v48  ;;  %v755_v30 = vadd.f32 %v754_v51, %v684_v53 }
 0x1cf   :  { %v757_v56 = vadd.f32 %v756_v55, %v686_v52  ;;  %v916_v61 = vadd.f32 %v904_v39, %v755_v30 }
 0x1d1   :  { %v917_v58 = vadd.f32 %v908_v57, %v757_v56  ;;  %v919_v5 = vmax.f32 %v916_v61, 0.0 }
 0x1d3   :  { %v920_v1 = vmax.f32 %v917_v58, 0.0  ;;  %v939_v12 = vmul.f32 %v927_v7, %v919_v5 }
 0x1d5   :  { %v940_v10 = vmul.f32 %v931_v0, %v920_v1 }
 0x1d7   :  { %v942_v14 = vadd.f32 %v940_v10, %v939_v12 }
 0x1eb   :  { %v996_v29 = vpop.f32.mrf.mxu0  ;;  %v1031_v35 = vpop.f32.mrf.mxu1 }
 0x1ed   :  { %v997_v59 = vpop.f32.mrf.mxu0  ;;  %v1032_v60 = vpop.f32.mrf.mxu1 }
 0x1ee   :  { %v998_v62 = vadd.f32 %v997_v59, %v996_v29  ;;  %v1033_v3 = vadd.f32 %v1032_v60, %v1031_v35 }
 0x1f0   :  { %v826_v2 = vadd.f32 %v998_v62, %v1249_v38 }
 0x1f2   :  { %v896_v6 = vadd.f32 %v1033_v3, %v826_v2 }
 0x1f4   :  { %v918_v8 = vadd.f32 %v912_v4, %v896_v6 }
 0x1f6   :  { %v921_v11 = vmax.f32 %v918_v8, 0.0 }
 0x1f8   :  { %v941_v13 = vmul.f32 %v935_v9, %v921_v11 }
 0x1fa   :  { %v943_v15 = vadd.f32 %v942_v14, %v941_v13 }
 0x1fc   :  { %944 = vadd.xlane.f32.xlu0 %v943_v15 }
 0x285   :  { %v945_v38 = vpop.xlane.xlu0 %944 }
 0x286   :  { %v948_v16 = vadd.f32 %v947_v21, %v945_v38 }
 0x288   :  { %950 = vst.msk [vmem:[%s1288_s9] sm:$0xff] %vm949_vm3, %v948_v16 }
 0x289   :  { %955 = vsyncpa [#allocation4], 1 }
 0x28a   :  { %956 = vsyncpa [#allocation6], 1 }
 0x28b   :  { %957 = vsyncpa [#allocation9], 1 }

</bundles_post_ra>
